<compile_context>
chip_gen: v7x
topology: tpu7x:2x2x1
jax: 0.10.0
libtpu: 0.0.40
codegen_flags: <defaults>
</compile_context>

<pallas_src>
import functools

import jax
import jax.numpy as jnp
from jax.experimental import pallas as pl
from jax.experimental.pallas import tpu as pltpu

_LANE = 128


def _round_up(x, m):
    return ((x + m - 1) // m) * m


@functools.lru_cache(maxsize=1)
def _hw_config():
    """Returns (num_tensorcores, tile_r_max, vmem_limit_bytes) for this part."""
    kind = ""
    try:
        kind = (jax.devices()[0].device_kind or "").lower()
    except Exception:
        pass
    vmem_phys = None
    try:
        vmem_phys = int(getattr(pltpu.get_tpu_info(),
                                "vmem_capacity_bytes", 0)) or None
    except Exception:
        pass
    small_vmem = vmem_phys is not None and vmem_phys <= (64 << 20)
    if "v7" in kind or small_vmem:
        # v7x-class: 2 TensorCores/chip, 64 MiB physical VMEM per TC.
        return 2, 4096, 48 << 20
    if any(g in kind for g in ("v5", "v6")) or (
            vmem_phys is not None and vmem_phys >= (96 << 20)):
        # v5e / v6e: 1 TensorCore, 128 MiB physical VMEM.
        return 1, 8192, 96 << 20
    # Unknown part: conservative sizing that fits every generation.
    return 1, 4096, 48 << 20


def _int_pow(x, n):
    """x**n for small non-negative integer n via VPU multiplies."""
    if n == 0:
        return jnp.ones_like(x)
    acc = x
    for _ in range(n - 1):
        acc = acc * x
    return acc


def _focal_elementwise(x, t, alpha, gamma):
    """Focal loss, log-domain formulation (matches the torch formula).

    loss = -alpha * sigmoid(-x)**g * t * logsigmoid(x)
           - (1-alpha) * sigmoid(x)**g * (1-t) * logsigmoid(-x)
    """
    ls_pos = jax.nn.log_sigmoid(x)        # log sigmoid(x)
    ls_neg = ls_pos - x                   # log sigmoid(-x)
    g_int = int(gamma)
    if float(gamma) == float(g_int) and 0 <= g_int <= 8:
        # Integer-gamma fast path (default gamma=2): one extra exp instead of
        # two, powers become cheap VPU multiplies.
        p = jnp.exp(ls_pos)               # sigmoid(x)  == probs_pos
        q = 1.0 - p                       # sigmoid(-x) == probs_neg
        w_pos = _int_pow(q, g_int)        # probs_neg ** gamma
        w_neg = _int_pow(p, g_int)        # probs_pos ** gamma
    else:
        w_pos = jnp.exp(gamma * ls_neg)
        w_neg = jnp.exp(gamma * ls_pos)
    return (-alpha * w_pos * t * ls_pos
            - (1.0 - alpha) * w_neg * (1.0 - t) * ls_neg)


def _focal_none_kernel(x_ref, t_ref, o_ref, *, alpha, gamma):
    x = x_ref[...].astype(jnp.float32)
    t = t_ref[...].astype(jnp.float32)
    o_ref[...] = _focal_elementwise(x, t, alpha, gamma).astype(o_ref.dtype)


def _focal_sum_kernel(x_ref, t_ref, o_ref, *, alpha, gamma,
                      tail_blk, tail_count):
    c = pl.program_id(0)          # core-split axis ("parallel")
    i = pl.program_id(1)          # row-block axis ("arbitrary", reduction)

    @pl.when(i == 0)
    def _():
        o_ref[...] = jnp.zeros_like(o_ref)

    x = x_ref[...].astype(jnp.float32)
    t = t_ref[...].astype(jnp.float32)
    loss = _focal_elementwise(x, t, alpha, gamma)

    # Logical (pre-clamp) block index of this grid step.
    blk = c * pl.num_programs(1) + i

    @pl.when(blk < tail_blk)
    def _():
        # Fully-valid interior block: no masking work at all.  Lane-parallel
        # partial sums into the VMEM-resident (8, 128) output block.
        o_ref[...] += loss.reshape(-1, 8, _LANE).sum(axis=0)

    @pl.when(blk == tail_blk)
    def _():
        # The (at most one) partially-valid tail block, and any clamped
        # duplicate of it from the core-split axis when the element count is
        # an exact multiple of the block size (tail_count == 0).  Uses
        # *within-block* indices only, so no int32 overflow for huge tensors.
        row = jax.lax.broadcasted_iota(jnp.int32, loss.shape, 0)
        lane = jax.lax.broadcasted_iota(jnp.int32, loss.shape, 1)
        # Keep the where (never multiply-by-mask): uninitialized VMEM in a
        # partial Pallas block may produce NaN/Inf before masking.
        masked = jnp.where(row * _LANE + lane < tail_count, loss, 0.0)
        o_ref[...] += masked.reshape(-1, 8, _LANE).sum(axis=0)
    # blk > tail_blk (clamped duplicate interior block): contributes nothing.


def binary_focal_loss_with_logits(logits, target, alpha=0.25, gamma=2.0,
                                  reduction="none"):
    logits = jnp.asarray(logits)
    target = jnp.asarray(target)
    if logits.ndim < 2:
        raise ValueError(f"Invalid input shape, we expect BxCx*. Got: {logits.shape}")
    if logits.shape[0] != target.shape[0]:
        raise ValueError(
            f"Expected input batch_size ({logits.shape[0]}) to match target "
            f"batch_size ({target.shape[0]}).")
    if reduction not in ("none", "mean", "sum"):
        raise NotImplementedError(f"Invalid reduction mode: {reduction}")

    orig_shape = logits.shape
    out_dtype = (logits.dtype if jnp.issubdtype(logits.dtype, jnp.floating)
                 else jnp.float32)

    # Keep the target stream as narrow as the logits stream: for bf16/f16
    # logits an f32 target would double its HBM traffic for no accuracy gain
    # (the kernel computes in f32 regardless).
    if jnp.dtype(out_dtype).itemsize == 2:
        if target.dtype != out_dtype:
            target = target.astype(out_dtype)
    elif not jnp.issubdtype(target.dtype, jnp.floating):
        target = target.astype(jnp.float32)

    alpha = float(alpha)
    gamma = float(gamma)
    n = logits.size

    if n == 0:
        if reduction == "none":
            return jnp.zeros(orig_shape, out_dtype)
        if reduction == "sum":
            return jnp.zeros((), out_dtype)
        return jnp.full((), jnp.nan, out_dtype)

    num_cores, tile_r_max, vmem_limit = _hw_config()

    xf = jnp.ravel(logits)
    tf = jnp.ravel(target)
    pad = (-n) % _LANE
    if pad:
        # Rare path (numel not a multiple of 128). Zero padding is fine: the
        # tail is sliced off ('none') or masked in-kernel ('sum'/'mean').
        xf = jnp.pad(xf, (0, pad))
        tf = jnp.pad(tf, (0, pad))
    rows = (n + pad) // _LANE

    # Sub-32-bit operands pack 16 rows per sublane tile; round the row tile
    # accordingly to avoid relayout copies.
    min_itemsize = min(jnp.dtype(xf.dtype).itemsize,
                       jnp.dtype(tf.dtype).itemsize,
                       jnp.dtype(out_dtype).itemsize)
    pack = 16 if min_itemsize < 4 else 8

    # Row tile: as large as the per-generation VMEM budget allows (amortizes
    # the ~0.35us per-grid-step overhead), but split >= num_cores ways so both
    # v7x TensorCores get work.
    rows_per_core = pl.cdiv(rows, num_cores) if num_cores > 1 else rows
    tile_r = min(tile_r_max, _round_up(rows_per_core, pack))
    nblocks = pl.cdiv(rows, tile_r)

    x2 = xf.reshape(rows, _LANE)
    t2 = tf.reshape(rows, _LANE)

    if reduction == "none":
        tile_spec = pl.BlockSpec((tile_r, _LANE), lambda i: (i, 0))
        out = pl.pallas_call(
            functools.partial(_focal_none_kernel, alpha=alpha, gamma=gamma),
            out_shape=jax.ShapeDtypeStruct((rows, _LANE), out_dtype),
            grid_spec=pltpu.PrefetchScalarGridSpec(
                num_scalar_prefetch=0,
                grid=(nblocks,),
                in_specs=[tile_spec, tile_spec],
                out_specs=tile_spec,
            ),
            compiler_params=pltpu.CompilerParams(
                dimension_semantics=("parallel",),
                vmem_limit_bytes=vmem_limit),
        )(x2, t2)
        if pad:
            return out.reshape(-1)[:n].reshape(orig_shape)
        return out.reshape(orig_shape)

    # 'sum' / 'mean'
    half = pl.cdiv(nblocks, num_cores)     # row-blocks per core
    last_blk = nblocks - 1
    block_elems = tile_r * _LANE
    tail_blk = n // block_elems            # first block that is not full
    tail_count = n - tail_blk * block_elems

    def in_map(c, i):
        # Clamp so an overrun block on the core-split axis never DMAs out of
        # bounds; the in-kernel block-index guard zeroes its contribution.
        return (jnp.minimum(c * half + i, last_blk), 0)

    in_spec = pl.BlockSpec((tile_r, _LANE), in_map)
    partials = pl.pallas_call(
        functools.partial(_focal_sum_kernel, alpha=alpha, gamma=gamma,
                          tail_blk=tail_blk, tail_count=tail_count),
        out_shape=jax.ShapeDtypeStruct((num_cores * 8, _LANE), jnp.float32),
        grid_spec=pltpu.PrefetchScalarGridSpec(
            num_scalar_prefetch=0,
            grid=(num_cores, half),
            in_specs=[in_spec, in_spec],
            out_specs=pl.BlockSpec((8, _LANE), lambda c, i: (c, 0)),
        ),
        compiler_params=pltpu.CompilerParams(
            dimension_semantics=("parallel", "arbitrary"),
            vmem_limit_bytes=vmem_limit),
    )(x2, t2)

    total = jnp.sum(partials)
    if reduction == "mean":
        total = total / jnp.float32(n)
    return total.astype(out_dtype)


class BinaryFocalLossWithLogits:
    """JAX/Pallas port of the PyTorch BinaryFocalLossWithLogits module."""

    def __init__(self, alpha: float, gamma: float = 2.0,
                 reduction: str = "none") -> None:
        self.alpha = alpha
        self.gamma = gamma
        self.reduction = reduction

    def __call__(self, input, target):
        return binary_focal_loss_with_logits(input, target, self.alpha,
                                              self.gamma, self.reduction)


def _reference(logits, target, alpha, gamma, reduction):
    """Pure-JAX reference mirroring the torch implementation verbatim."""
    x = logits.astype(jnp.float32)
    t = target.astype(jnp.float32)
    probs_pos = jax.nn.sigmoid(x)
    probs_neg = jax.nn.sigmoid(-x)
    loss = (-alpha * probs_neg ** gamma * t * jax.nn.log_sigmoid(x)
            - (1.0 - alpha) * probs_pos ** gamma * (1.0 - t)
            * jax.nn.log_sigmoid(-x))
    if reduction == "none":
        return loss
    if reduction == "mean":
        return jnp.mean(loss)
    return jnp.sum(loss)


if __name__ == "__main__":
    key = jax.random.PRNGKey(0)
    k1, k2, k3, k4 = jax.random.split(key, 4)

    ok = True

    test_cases = []
    # NCHW-style input from the ddn_loss caller (lane-aligned fast path).
    x_a = jax.random.normal(k1, (2, 4, 16, 16), dtype=jnp.float32) * 3.0
    t_a = jax.random.bernoulli(k2, 0.3, (2, 4, 16, 16)).astype(jnp.float32)
    test_cases.append((x_a, t_a))
    # Ragged shape exercising the pad fallback + in-kernel tail mask.
    x_b = jax.random.normal(k3, (2, 3, 7, 5), dtype=jnp.float32) * 4.0
    t_b = jax.random.bernoulli(k4, 0.5, (2, 3, 7, 5)).astype(jnp.float32)
    test_cases.append((x_b, t_b))

    for x, tgt in test_cases:
        for reduction in ("none", "mean", "sum"):
            loss_fn = BinaryFocalLossWithLogits(alpha=0.25, gamma=2.0,
                                                reduction=reduction)
            out = jax.block_until_ready(loss_fn(x, tgt))
            ref = jax.block_until_ready(
                _reference(x, tgt, 0.25, 2.0, reduction))
            if not jnp.allclose(out, ref, rtol=1e-4, atol=1e-5):
                ok = False
                print(f"MISMATCH shape={tuple(x.shape)} reduction={reduction}: "
                      f"max abs err {jnp.max(jnp.abs(out - ref))}")

    # Non-integer gamma exercises the generic exp(gamma * logsigmoid) path.
    out_g = jax.block_until_ready(
        BinaryFocalLossWithLogits(0.25, 1.5, "sum")(x_a, t_a))
    ref_g = jax.block_until_ready(_reference(x_a, t_a, 0.25, 1.5, "sum"))
    if not jnp.allclose(out_g, ref_g, rtol=1e-4, atol=1e-5):
        ok = False
        print(f"MISMATCH non-integer gamma: {out_g} vs {ref_g}")

    # bf16 fast path (16-bit target stream, 16-row sublane tiles).
    x_c16 = x_a.astype(jnp.bfloat16)
    t_c16 = t_a.astype(jnp.bfloat16)
    out_b = jax.block_until_ready(
        BinaryFocalLossWithLogits(0.25, 2.0, "sum")(x_c16, t_c16))
    ref_b = jax.block_until_ready(
        _reference(x_c16.astype(jnp.float32), t_c16.astype(jnp.float32),
                   0.25, 2.0, "sum"))
    if not jnp.allclose(jnp.float32(out_b), ref_b, rtol=2e-2, atol=2e-2):
        ok = False
        print(f"MISMATCH bf16 sum: {out_b} vs {ref_b}")

    # Known value from the kornia/torch docstring example.
    logits = jnp.array([[[6.325]], [[5.26]], [[87.49]]], dtype=jnp.float32)
    labels = jnp.array([[[1.0]], [[1.0]], [[0.0]]], dtype=jnp.float32)
    doc = BinaryFocalLossWithLogits(alpha=0.25, gamma=2.0,
                                    reduction="mean")(logits, labels)
    doc = jax.block_until_ready(doc)
    if not jnp.allclose(doc, 21.8725, atol=1e-3):
        ok = False
        print(f"MISMATCH docstring example: got {doc}")

    if ok:
        print("KERNEL_OK")
</pallas_src>

<mosaic_0001>
module attributes {stable_mosaic.version = 11 : i64} {
  func.func @_focal_none_kernel(%arg0: i32, %arg1: memref<16x128xf32, #tpu.memory_space<vmem>>, %arg2: memref<16x128xf32, #tpu.memory_space<vmem>>, %arg3: memref<16x128xf32, #tpu.memory_space<vmem>>) attributes {dimension_semantics = [#tpu.dimension_semantics<parallel>], iteration_bounds = array<i64: 1>, scalar_prefetch = 0 : i64, scratch_operands = 0 : i64, tpu.core_type = #tpu.core_type<tc>, window_params = [{transform_indices = @transform_0, window_bounds = array<i64: 16, 128>}, {transform_indices = @transform_1, window_bounds = array<i64: 16, 128>}, {transform_indices = @transform_2, window_bounds = array<i64: 16, 128>}]} {
    %c0 = arith.constant 0 : index
    %c0_0 = arith.constant 0 : index
    %0 = vector.load %arg1[%c0, %c0_0] : memref<16x128xf32, #tpu.memory_space<vmem>>, vector<16x128xf32>
    %c0_1 = arith.constant 0 : index
    %c0_2 = arith.constant 0 : index
    %1 = vector.load %arg2[%c0_1, %c0_2] : memref<16x128xf32, #tpu.memory_space<vmem>>, vector<16x128xf32>
    %cst = arith.constant 0.000000e+00 : f32
    %2 = vector.broadcast %cst : f32 to vector<16x128xf32>
    %3 = arith.subf %2, %0 : vector<16x128xf32>
    %cst_3 = arith.constant 0.000000e+00 : f32
    %4 = vector.broadcast %cst_3 : f32 to vector<16x128xf32>
    %5 = arith.maximumf %3, %4 : vector<16x128xf32>
    %6 = vector.broadcast %cst_3 : f32 to vector<16x128xf32>
    %7 = arith.subf %3, %6 : vector<16x128xf32>
    %8 = arith.cmpf one, %7, %7 : vector<16x128xf32>
    %9 = vector.broadcast %cst_3 : f32 to vector<16x128xf32>
    %10 = arith.addf %3, %9 : vector<16x128xf32>
    %11 = math.absf %7 : vector<16x128xf32>
    %cst_4 = arith.constant 0.000000e+00 : f32
    %12 = vector.broadcast %cst_4 : f32 to vector<16x128xf32>
    %13 = arith.subf %12, %11 : vector<16x128xf32>
    %14 = math.exp %13 : vector<16x128xf32>
    %15 = math.log1p %14 : vector<16x128xf32>
    %16 = arith.addf %5, %15 : vector<16x128xf32>
    %17 = arith.select %8, %10, %16 : vector<16x128xi1>, vector<16x128xf32>
    %cst_5 = arith.constant 0.000000e+00 : f32
    %18 = vector.broadcast %cst_5 : f32 to vector<16x128xf32>
    %19 = arith.subf %18, %17 : vector<16x128xf32>
    %20 = arith.subf %19, %0 : vector<16x128xf32>
    %21 = math.exp %19 : vector<16x128xf32>
    %cst_6 = arith.constant 1.000000e+00 : f32
    %22 = vector.broadcast %cst_6 : f32 to vector<16x128xf32>
    %23 = arith.subf %22, %21 : vector<16x128xf32>
    %24 = arith.mulf %23, %23 : vector<16x128xf32>
    %25 = arith.mulf %21, %21 : vector<16x128xf32>
    %cst_7 = arith.constant -2.500000e-01 : f32
    %26 = vector.broadcast %cst_7 : f32 to vector<16x128xf32>
    %27 = arith.mulf %26, %24 : vector<16x128xf32>
    %28 = arith.mulf %27, %1 : vector<16x128xf32>
    %29 = arith.mulf %28, %19 : vector<16x128xf32>
    %cst_8 = arith.constant 7.500000e-01 : f32
    %30 = vector.broadcast %cst_8 : f32 to vector<16x128xf32>
    %31 = arith.mulf %30, %25 : vector<16x128xf32>
    %cst_9 = arith.constant 1.000000e+00 : f32
    %32 = vector.broadcast %cst_9 : f32 to vector<16x128xf32>
    %33 = arith.subf %32, %1 : vector<16x128xf32>
    %34 = arith.mulf %31, %33 : vector<16x128xf32>
    %35 = arith.mulf %34, %20 : vector<16x128xf32>
    %36 = arith.subf %29, %35 : vector<16x128xf32>
    %c0_10 = arith.constant 0 : index
    %c0_11 = arith.constant 0 : index
    %37 = vector.load %arg3[%c0_10, %c0_11] : memref<16x128xf32, #tpu.memory_space<vmem>>, vector<16x128xf32>
    tpu.vector_store %arg3[%c0_10, %c0_11], %36 {strides = array<i32>} : memref<16x128xf32, #tpu.memory_space<vmem>>, vector<16x128xf32>,
    return
  }
  func.func @transform_0(%arg0: i32) -> (i32, i32) {
    %c0_i32 = arith.constant 0 : i32
    %c0_i32_0 = arith.constant 0 : i32
    return %arg0, %c0_i32 : i32, i32
  }
  func.func @transform_1(%arg0: i32) -> (i32, i32) {
    %c0_i32 = arith.constant 0 : i32
    %c0_i32_0 = arith.constant 0 : i32
    return %arg0, %c0_i32 : i32, i32
  }
  func.func @transform_2(%arg0: i32) -> (i32, i32) {
    %c0_i32 = arith.constant 0 : i32
    %c0_i32_0 = arith.constant 0 : i32
    return %arg0, %c0_i32 : i32, i32
  }
}

</mosaic_0001>

<bundles_post_ra>
// kernel: tpu_custom_call.1
= control target key start
LH: loop header
LB: loop body
LE: loop exit
PB: predicated region body
PF: predicated region fallthrough
CT: control target
= control target key end

     0   :  { %7 = vsyncpa [#allocation3], 0  ;;  %s294_s0 = inlined_call_operand.hbm [shape: f32[16,128], index: 0, kind: input, shape index: {}]   ;;  %s295_s1 = inlined_call_operand.hbm [shape: f32[16,128], index: 1, kind: input, shape index: {}]   ;;  %s296_s2 = inlined_call_operand.hbm [shape: f32[16,128], index: 2, kind: output, shape index: {}]  }
   0x1   :  { %8 = vsyncpa [#allocation6], 0 }
   0x2   :  { %9 = vsyncpa [#allocation4], 0  ;;  %s221_s9 = smov [#allocation2]   ;;  %s149_s13 = scalar_lea.hbm %s294_s0, 256 }
   0x3   :  { %s15_s10 = sshll.u32 %s221_s9, 4  ;;  %p150_p0 = scmp.ne.s32.totalorder %s294_s0, %s149_s13  ;;  %s16_s10 = int_to_ptr.vmem [resolvable:$true] %s15_s10 }
   0x4   :  { %p153_p1 = scmp.lt.u32.totalorder %s149_s13, %s294_s0 }
   0x6   :  { %p155_p2 = pnand %p153_p1, %p150_p0 }
   0x8   :  { %158 = shalt.err (!%p155_p2)
}
   0x9   :  { %s159_s18 = scalar_lea.vmem %s16_s10, 256  ;;  %p164_p4 = scmp.lt.s32.totalorder %s16_s10, %s16_s10 }
   0xa   :  { %p160_p3 = scmp.ne.s32.totalorder %s16_s10, %s159_s18  ;;  %p165_p5 = scmp.lt.s32.totalorder %s159_s18, %s159_s18 }
   0xc   :  { %p166_p6 = por %p165_p5, %p164_p4 }
   0xe   :  { %p167_p7 = pnand %p166_p6, %p160_p3 }
  0x10   :  { %170 = shalt.err (!%p167_p7)
}
  0x11   :  { %s222_s19 = smov 128   ;;  %s223_s20 = smov 8  }
  0x12   :  { %21 = dma.hbm_to_vmem [thread:$0]  %s294_s0, 256, %s16_s10, [#allocation3], %s222_s19, %s222_s19, %s223_s20  }
  0x13   :  { %s224_s23 = smov [#allocation5]   ;;  %s171_s27 = scalar_lea.hbm %s295_s1, 256 }
  0x14   :  { %s27_s24 = sshll.u32 %s224_s23, 4  ;;  %p172_p8 = scmp.ne.s32.totalorder %s295_s1, %s171_s27  ;;  %s28_s24 = int_to_ptr.vmem [resolvable:$true] %s27_s24 }
  0x15   :  { %p175_p9 = scmp.lt.u32.totalorder %s171_s27, %s295_s1 }
  0x17   :  { %p177_p10 = pnand %p175_p9, %p172_p8 }
  0x19   :  { %180 = shalt.err (!%p177_p10)
}
  0x1a   :  { %s181_s4 = scalar_lea.vmem %s28_s24, 256  ;;  %p186_p12 = scmp.lt.s32.totalorder %s28_s24, %s28_s24 }
  0x1b   :  { %p182_p11 = scmp.ne.s32.totalorder %s28_s24, %s181_s4  ;;  %p187_p13 = scmp.lt.s32.totalorder %s181_s4, %s181_s4 }
  0x1d   :  { %p188_p0 = por %p187_p13, %p186_p12 }
  0x1f   :  { %p189_p1 = pnand %p188_p0, %p182_p11 }
  0x21   :  { %192 = shalt.err (!%p189_p1)
}
  0x22   :  { %33 = dma.hbm_to_vmem [thread:$0]  %s295_s1, 256, %s28_s24, [#allocation6], %s222_s19, %s222_s19, %s223_s20  }
  0x23   :  { %215 = dma.done.wait [#allocation3], 256  }
  0x24   :  { %216 = vsyncadd [#allocation3], 4294967040 }
  0x25   :  { %217 = dma.done.wait [#allocation6], 256  }
  0x26   :  { %218 = vsyncadd [#allocation6], 4294967040  ;;  %v271_v0 = vld [vmem:[#allocation2] sm:$0xff]  ;;  %v273_v1 = vld [vmem:[#allocation2 + $0x8] sm:$0xff]  ;;  %s225_s1 = smov [#allocation7]  }
  0x27   :  { %v44_v2 = vsub.f32 0.0, %v271_v0  ;;  %v45_v3 = vsub.f32 0.0, %v273_v1  ;;  %v42_v38 = vld [vmem:[#allocation5] sm:$0xff]  ;;  %v43_v39 = vld [vmem:[#allocation5 + $0x8] sm:$0xff]  ;;  %s119_s6 = sshll.u32 %s225_s1, 4  ;;  %s120_s6 = int_to_ptr.vmem [resolvable:$true] %s119_s6 }
  0x28   :  { %v104_v44 = vsub.f32 1.0, %v42_v38  ;;  %v105_v47 = vsub.f32 1.0, %v43_v39  ;;  %s193_s7 = scalar_lea.vmem %s120_s6, 256  ;;  %p198_p3 = scmp.lt.s32.totalorder %s120_s6, %s120_s6 }
  0x29   :  { %v52_v4 = vand.u32 2147483647, %v44_v2  ;;  %v53_v5 = vand.u32 2147483647, %v45_v3  ;;  %v46_v22 = vmax.f32 %v44_v2, 0.0  ;;  %v47_v26 = vmax.f32 %v45_v3, 0.0  ;;  %p194_p2 = scmp.ne.s32.totalorder %s120_s6, %s193_s7  ;;  %p199_p4 = scmp.lt.s32.totalorder %s193_s7, %s193_s7 }
  0x2a   :  { %vm48_vm2 = vcmp.ne.f32.partialorder %v44_v2, %v44_v2  ;;  %vm49_vm3 = vcmp.ne.f32.partialorder %v45_v3, %v45_v3 }
  0x2b   :  { %v54_v6 = vsub.f32 0.0, %v52_v4  ;;  %v55_v7 = vsub.f32 0.0, %v53_v5  ;;  %p200_p5 = por %p199_p4, %p198_p3 }
  0x2d   :  { %v56_v8 = vmul.f32 1.442695, %v54_v6  ;;  %v58_v9 = vmul.f32 1.442695, %v55_v7  ;;  %p201_p6 = pnand %p200_p5, %p194_p2 }
  0x2f   :  { %137 = vpow2.f32 %v56_v8 }
  0x30   :  { %139 = vpow2.f32 %v58_v9 }
  0x39   :  { %v138_v10 = vpop.eup %137 }
  0x3a   :  { %v140_v11 = vpop.eup %139  ;;  %v60_v12 = vadd.f32 1.0, %v138_v10  ;;  %v63_v14 = vmul.f32 -0.5, %v138_v10  ;;  %v66_v17 = vand.u32 2147483647, %v138_v10 }
  0x3b   :  { %v69_v13 = vadd.f32 1.0, %v140_v11  ;;  %v72_v15 = vmul.f32 -0.5, %v140_v11  ;;  %v75_v19 = vand.u32 2147483647, %v140_v11 }
  0x3c   :  { %141 = vlog2.f32 %v60_v12  ;;  %v64_v16 = vadd.f32 1.0, %v63_v14  ;;  %vm67_vm0 = vcmp.lt.f32.partialorder %v66_v17, 0.0004427343 }
  0x3d   :  { %143 = vlog2.f32 %v69_v13  ;;  %v73_v18 = vadd.f32 1.0, %v72_v15  ;;  %vm76_vm1 = vcmp.lt.f32.partialorder %v75_v19, 0.0004427343 }
  0x3e   :  { %v65_v20 = vmul.f32 %v138_v10, %v64_v16 }
  0x3f   :  { %v74_v23 = vmul.f32 %v140_v11, %v73_v18 }
  0x46   :  { %v142_v21 = vpop.eup %141 }
  0x47   :  { %v144_v24 = vpop.eup %143  ;;  %v62_v25 = vmul.f32 0.6931472, %v142_v21 }
  0x48   :  { %v71_v27 = vmul.f32 0.6931472, %v144_v24 }
  0x49   :  { %v68_v28 = vsel %vm67_vm0, %v65_v20, %v62_v25 }
  0x4a   :  { %v78_v29 = vadd.f32 %v68_v28, %v46_v22  ;;  %v77_v30 = vsel %vm76_vm1, %v74_v23, %v71_v27 }
  0x4b   :  { %v79_v31 = vadd.f32 %v77_v30, %v47_v26 }
  0x4c   :  { %v80_v32 = vsel %vm48_vm2, %v44_v2, %v78_v29 }
  0x4d   :  { %v82_v33 = vsub.f32 0.0, %v80_v32  ;;  %v81_v34 = vsel %vm49_vm3, %v45_v3, %v79_v31 }
  0x4e   :  { %v83_v35 = vsub.f32 0.0, %v81_v34 }
  0x4f   :  { %v86_v36 = vmul.f32 1.442695, %v82_v33  ;;  %v84_v48 = vsub.f32 %v82_v33, %v271_v0 }
  0x50   :  { %v88_v37 = vmul.f32 1.442695, %v83_v35  ;;  %v85_v51 = vsub.f32 %v83_v35, %v273_v1 }
  0x51   :  { %145 = vpow2.f32 %v86_v36 }
  0x52   :  { %147 = vpow2.f32 %v88_v37 }
  0x5b   :  { %v146_v40 = vpop.eup %145 }
  0x5c   :  { %v148_v41 = vpop.eup %147  ;;  %v90_v42 = vsub.f32 1.0, %v146_v40  ;;  %v94_v43 = vmul.f32 %v146_v40, %v146_v40 }
  0x5d   :  { %v91_v45 = vsub.f32 1.0, %v148_v41  ;;  %v95_v46 = vmul.f32 %v148_v41, %v148_v41 }
  0x5e   :  { %v92_v49 = vmul.f32 %v90_v42, %v90_v42  ;;  %v102_v50 = vmul.f32 0.75, %v94_v43 }
  0x5f   :  { %v93_v52 = vmul.f32 %v91_v45, %v91_v45  ;;  %v103_v53 = vmul.f32 0.75, %v95_v46 }
  0x60   :  { %v96_v54 = vmul.f32 -0.25, %v92_v49  ;;  %v106_v55 = vmul.f32 %v104_v44, %v102_v50 }
  0x61   :  { %v97_v56 = vmul.f32 -0.25, %v93_v52  ;;  %v107_v57 = vmul.f32 %v105_v47, %v103_v53 }
  0x62   :  { %v98_v58 = vmul.f32 %v96_v54, %v42_v38  ;;  %v108_v59 = vmul.f32 %v106_v55, %v84_v48 }
  0x63   :  { %v99_v60 = vmul.f32 %v97_v56, %v43_v39  ;;  %v109_v61 = vmul.f32 %v107_v57, %v85_v51 }
  0x64   :  { %v100_v62 = vmul.f32 %v98_v58, %v82_v33 }
  0x65   :  { %v101_v63 = vmul.f32 %v99_v60, %v83_v35 }
  0x66   :  { %v110_v2 = vsub.f32 %v100_v62, %v108_v59 }
  0x67   :  { %v111_v0 = vsub.f32 %v101_v63, %v109_v61 }
  0x68   :  { %112 = vst [vmem:[#allocation7] sm:$0xff] %v110_v2 }
  0x69   :  { %113 = vst [vmem:[#allocation7 + $0x8] sm:$0xff] %v111_v0 }
  0x6a   :  { %204 = shalt.err (!%p201_p6)
}
  0x6b   :  { %s205_s10 = scalar_lea.hbm %s296_s2, 256 }
  0x6c   :  { %p206_p7 = scmp.ne.s32.totalorder %s296_s2, %s205_s10  ;;  %p209_p8 = scmp.lt.u32.totalorder %s205_s10, %s296_s2 }
  0x6e   :  { %p211_p9 = pnand %p209_p8, %p206_p7 }
  0x70   :  { %214 = shalt.err (!%p211_p9)
}
  0x71   :  { %125 = dma.vmem_to_hbm [thread:$0]  %s120_s6, 256, %s296_s2, [#allocation4], %s222_s19, %s222_s19, %s223_s20  }
  0x72   :  { %219 = dma.done.wait [#allocation4], 256  }
  0x73   :  { %220 = vsyncadd [#allocation4], 4294967040 }
  0x74   :  { %129 = vsyncpa [#allocation3], 1 }
  0x75   :  { %130 = vsyncpa [#allocation6], 1 }
  0x76   :  { %131 = vsyncpa [#allocation4], 1 }

</bundles_post_ra>
